<compile_context>
chip_gen: v7x
topology: tpu7x:2x2x1
jax: 0.10.0
libtpu: 0.0.40
codegen_flags: <defaults>
</compile_context>

<pallas_src>
import functools

import jax
import jax.numpy as jnp
import numpy as np
from jax.experimental import pallas as pl
from jax.experimental.pallas import tpu as pltpu


def _round_up(x, m):
    return (x + m - 1) // m * m


def make_temporal_block_kernel(K, dil, L, C_in, C_out, C_in_p, C_out_p, Lr,
                               has_downsample):
    """Per-batch kernel. Grid axis 0 iterates over batch ('parallel')."""
    shifts = [(K - 1 - k) * dil for k in range(K)]  # causal left-shift per tap

    def kernel(*refs):
        if has_downsample:
            (x_ref, w1_ref, b1_ref, w2_ref, b2_ref, wd_ref, bd_ref,
             o_ref, xs_ref, hs_ref) = refs
        else:
            (x_ref, w1_ref, b1_ref, w2_ref, b2_ref,
             o_ref, xs_ref, hs_ref) = refs

        # Scratch persists across grid steps; zero per step (parallel-safe, cheap).
        xs_ref[...] = jnp.zeros_like(xs_ref)
        hs_ref[...] = jnp.zeros_like(hs_ref)

        # ---- stage conv1 input: K causally-shifted copies of x, stacked on sublanes ----
        x = x_ref[0]                                              # (C_in, L)
        for k, s in enumerate(shifts):
            xs_ref[k * C_in_p:k * C_in_p + C_in, s:s + L] = x

        # ---- conv1: single MXU matmul over the folded taps ----
        acc1 = jnp.dot(w1_ref[...], xs_ref[...],
                       preferred_element_type=jnp.float32)        # (C_out_p, Lr)
        h = jnp.maximum(acc1 + b1_ref[...], 0.0)                  # bias+chomp+ReLU (f32)

        # ---- stage conv2 input (only the L valid lanes of h) ----
        hval = h[:, :L].astype(hs_ref.dtype)
        for k, s in enumerate(shifts):
            hs_ref[k * C_out_p:k * C_out_p + C_out_p, s:s + L] = hval

        # ---- conv2: single MXU matmul over the folded taps ----
        acc2 = jnp.dot(w2_ref[...], hs_ref[...],
                       preferred_element_type=jnp.float32)
        out = jnp.maximum(acc2 + b2_ref[...], 0.0)

        # ---- residual: 1x1 downsample conv, or identity (requires C_in == C_out) ----
        x0 = xs_ref[(K - 1) * C_in_p:K * C_in_p, :]               # unshifted tap, aligned
        if has_downsample:
            res = jnp.dot(wd_ref[...], x0,
                          preferred_element_type=jnp.float32) + bd_ref[...]
        else:
            res = x0.astype(jnp.float32)

        o_ref[0] = jnp.maximum(out + res, 0.0).astype(o_ref.dtype)

    return kernel


def temporal_block_forward(x, params, *, kernel_size, dilation, padding,
                           compute_dtype=jnp.float32):
    """x: (B, C_in, L) float32. Returns (B, C_out, L) float32 (eval mode)."""
    B, C_in, L = x.shape
    w1, b1, w2, b2, wd, bd = params
    C_out = w1.shape[0]
    K = kernel_size
    assert padding == (K - 1) * dilation, "causal TCN padding expected"
    has_downsample = wd is not None
    if not has_downsample:
        assert C_in == C_out, "identity residual requires C_in == C_out"

    cdt = jnp.dtype(compute_dtype)
    sub = 8 if cdt.itemsize == 4 else 16            # sublane multiple for this dtype
    C_in_p = _round_up(C_in, sub)
    C_out_p = _round_up(C_out, sub)
    Lr = _round_up(L + padding, 128)                # lane-dense time (room for max shift)

    # ---- pack weights: fold taps into (C_out_p, K*C_p), zero-pad channels ----
    w1f = jnp.zeros((C_out_p, K * C_in_p), cdt)
    w2f = jnp.zeros((C_out_p, K * C_out_p), cdt)
    for k in range(K):
        w1f = w1f.at[:C_out, k * C_in_p:k * C_in_p + C_in].set(w1[:, :, k].astype(cdt))
        w2f = w2f.at[:C_out, k * C_out_p:k * C_out_p + C_out].set(w2[:, :, k].astype(cdt))
    b1c = jnp.zeros((C_out_p, 1), jnp.float32).at[:C_out, 0].set(b1)
    b2c = jnp.zeros((C_out_p, 1), jnp.float32).at[:C_out, 0].set(b2)

    inputs = [x.astype(cdt), w1f, b1c, w2f, b2c]
    in_specs = [
        pl.BlockSpec((1, C_in, L), lambda b: (b, 0, 0)),           # x, unpadded
        pl.BlockSpec((C_out_p, K * C_in_p), lambda b: (0, 0)),     # folded conv1 weight
        pl.BlockSpec((C_out_p, 1), lambda b: (0, 0)),              # b1
        pl.BlockSpec((C_out_p, K * C_out_p), lambda b: (0, 0)),    # folded conv2 weight
        pl.BlockSpec((C_out_p, 1), lambda b: (0, 0)),              # b2
    ]
    if has_downsample:
        wdp = jnp.zeros((C_out_p, C_in_p), cdt).at[:C_out, :C_in].set(wd.astype(cdt))
        bdc = jnp.zeros((C_out_p, 1), jnp.float32).at[:C_out, 0].set(bd)
        inputs += [wdp, bdc]
        in_specs += [
            pl.BlockSpec((C_out_p, C_in_p), lambda b: (0, 0)),     # 1x1 downsample weight
            pl.BlockSpec((C_out_p, 1), lambda b: (0, 0)),          # bd
        ]

    kernel = make_temporal_block_kernel(K, dilation, L, C_in, C_out,
                                        C_in_p, C_out_p, Lr, has_downsample)

    out = pl.pallas_call(
        kernel,
        out_shape=jax.ShapeDtypeStruct((B, C_out_p, Lr), jnp.float32),
        grid_spec=pltpu.PrefetchScalarGridSpec(
            num_scalar_prefetch=0,
            grid=(B,),
            in_specs=in_specs,
            out_specs=pl.BlockSpec((1, C_out_p, Lr), lambda b: (b, 0, 0)),
            scratch_shapes=[
                pltpu.VMEM((K * C_in_p, Lr), cdt),    # stacked shifted x taps
                pltpu.VMEM((K * C_out_p, Lr), cdt),   # stacked shifted h taps
            ],
        ),
        compiler_params=pltpu.CompilerParams(
            dimension_semantics=("parallel",)),
    )(*inputs)
    return out[:, :C_out, :L]   # drop channel/lane padding (layout plumbing)


def weight_norm_effective(v, g):
    """PyTorch weight_norm (dim=0): w = g * v / ||v|| (norm over all dims but 0)."""
    norm = jnp.sqrt(jnp.sum(v * v, axis=tuple(range(1, v.ndim)), keepdims=True))
    return g.reshape((-1,) + (1,) * (v.ndim - 1)) * v / norm


def reference_forward(x, params, *, kernel_size, dilation, padding):
    """Pure-JAX reference mirroring the PyTorch module (eval mode)."""
    w1, b1, w2, b2, wd, bd = params

    def conv(x, w, b, dil, pad):
        y = jax.lax.conv_general_dilated(
            x, w, window_strides=(1,), padding=[(pad, pad)],
            rhs_dilation=(dil,), dimension_numbers=("NCH", "OIH", "NCH"))
        return y + b[None, :, None]

    h = conv(x, w1, b1, dilation, padding)[:, :, :-padding]   # chomp
    h = jnp.maximum(h, 0.0)
    h = conv(h, w2, b2, dilation, padding)[:, :, :-padding]   # chomp
    h = jnp.maximum(h, 0.0)
    res = conv(x, wd[:, :, None], bd, 1, 0)
    return jnp.maximum(h + res, 0.0)


if __name__ == "__main__":
    # Small TCN block: n_inputs=4, n_outputs=8, kernel_size=3, stride=1,
    # dilation=2, padding=(3-1)*2=4, activation=ReLU.
    B, C_in, C_out, L = 2, 4, 8, 16
    K, dilation = 3, 2
    padding = (K - 1) * dilation

    key = jax.random.PRNGKey(0)
    ks = jax.random.split(key, 8)

    # weight_norm parameterization: v ~ N(0, 0.01), g = ||v|| per out channel
    v1 = 0.01 * jax.random.normal(ks[0], (C_out, C_in, K), jnp.float32)
    g1 = jnp.sqrt(jnp.sum(v1 * v1, axis=(1, 2)))
    w1 = weight_norm_effective(v1, g1)
    b1 = 0.1 * jax.random.normal(ks[1], (C_out,), jnp.float32)

    v2 = 0.01 * jax.random.normal(ks[2], (C_out, C_out, K), jnp.float32)
    g2 = jnp.sqrt(jnp.sum(v2 * v2, axis=(1, 2)))
    w2 = weight_norm_effective(v2, g2)
    b2 = 0.1 * jax.random.normal(ks[3], (C_out,), jnp.float32)

    wd = 0.01 * jax.random.normal(ks[4], (C_out, C_in), jnp.float32)  # 1x1 conv
    bd = 0.1 * jax.random.normal(ks[5], (C_out,), jnp.float32)

    x = jax.random.normal(ks[6], (B, C_in, L), jnp.float32)

    params = (w1, b1, w2, b2, wd, bd)

    fwd = functools.partial(temporal_block_forward,
                            kernel_size=K, dilation=dilation, padding=padding)
    out = jax.block_until_ready(fwd(x, params))

    ref = reference_forward(x, params, kernel_size=K, dilation=dilation,
                            padding=padding)
    np.testing.assert_allclose(np.asarray(out), np.asarray(ref),
                               rtol=1e-5, atol=1e-5)
    print("KERNEL_OK")
</pallas_src>

<mosaic_0001>
module attributes {stable_mosaic.version = 11 : i64} {
  func.func @kernel(%arg0: i32, %arg1: memref<1x4x16xf32, #tpu.memory_space<vmem>>, %arg2: memref<8x24xf32, #tpu.memory_space<vmem>>, %arg3: memref<8x1xf32, #tpu.memory_space<vmem>>, %arg4: memref<8x24xf32, #tpu.memory_space<vmem>>, %arg5: memref<8x1xf32, #tpu.memory_space<vmem>>, %arg6: memref<8x8xf32, #tpu.memory_space<vmem>>, %arg7: memref<8x1xf32, #tpu.memory_space<vmem>>, %arg8: memref<1x8x128xf32, #tpu.memory_space<vmem>>, %arg9: memref<24x128xf32, #tpu.memory_space<vmem>>, %arg10: memref<24x128xf32, #tpu.memory_space<vmem>>) attributes {dimension_semantics = [#tpu.dimension_semantics<parallel>], iteration_bounds = array<i64: 2>, scalar_prefetch = 0 : i64, scratch_operands = 2 : i64, tpu.core_type = #tpu.core_type<tc>, window_params = [{transform_indices = @transform_0, window_bounds = array<i64: 1, 4, 16>}, {pipeline_mode = #tpu.pipeline_mode<synchronous>, transform_indices = @transform_1, window_bounds = array<i64: 8, 24>}, {pipeline_mode = #tpu.pipeline_mode<synchronous>, transform_indices = @transform_2, window_bounds = array<i64: 8, 1>}, {pipeline_mode = #tpu.pipeline_mode<synchronous>, transform_indices = @transform_3, window_bounds = array<i64: 8, 24>}, {pipeline_mode = #tpu.pipeline_mode<synchronous>, transform_indices = @transform_4, window_bounds = array<i64: 8, 1>}, {pipeline_mode = #tpu.pipeline_mode<synchronous>, transform_indices = @transform_5, window_bounds = array<i64: 8, 8>}, {pipeline_mode = #tpu.pipeline_mode<synchronous>, transform_indices = @transform_6, window_bounds = array<i64: 8, 1>}, {transform_indices = @transform_7, window_bounds = array<i64: 1, 8, 128>}]} {
    %cst = arith.constant 0.000000e+00 : f32
    %0 = vector.broadcast %cst : f32 to vector<24x128xf32>
    %c0 = arith.constant 0 : index
    %c0_0 = arith.constant 0 : index
    %1 = vector.load %arg9[%c0, %c0_0] : memref<24x128xf32, #tpu.memory_space<vmem>>, vector<24x128xf32>
    tpu.vector_store %arg9[%c0, %c0_0], %0 {strides = array<i32>} : memref<24x128xf32, #tpu.memory_space<vmem>>, vector<24x128xf32>,
    %cst_1 = arith.constant 0.000000e+00 : f32
    %2 = vector.broadcast %cst_1 : f32 to vector<24x128xf32>
    %c0_2 = arith.constant 0 : index
    %c0_3 = arith.constant 0 : index
    %3 = vector.load %arg10[%c0_2, %c0_3] : memref<24x128xf32, #tpu.memory_space<vmem>>, vector<24x128xf32>
    tpu.vector_store %arg10[%c0_2, %c0_3], %2 {strides = array<i32>} : memref<24x128xf32, #tpu.memory_space<vmem>>, vector<24x128xf32>,
    %c0_4 = arith.constant 0 : index
    %c0_5 = arith.constant 0 : index
    %c0_6 = arith.constant 0 : index
    %4 = vector.load %arg1[%c0_4, %c0_5, %c0_6] : memref<1x4x16xf32, #tpu.memory_space<vmem>>, vector<1x4x16xf32>
    %5 = vector.shape_cast %4 : vector<1x4x16xf32> to vector<4x16xf32>
    %c0_7 = arith.constant 0 : index
    %c4 = arith.constant 4 : index
    %6 = vector.load %arg9[%c0_7, %c4] : memref<24x128xf32, #tpu.memory_space<vmem>>, vector<4x16xf32>
    tpu.vector_store %arg9[%c0_7, %c4], %5 {strides = array<i32>} : memref<24x128xf32, #tpu.memory_space<vmem>>, vector<4x16xf32>,
    %c8 = arith.constant 8 : index
    %c2 = arith.constant 2 : index
    %7 = vector.load %arg9[%c8, %c2] : memref<24x128xf32, #tpu.memory_space<vmem>>, vector<4x16xf32>
    tpu.vector_store %arg9[%c8, %c2], %5 {strides = array<i32>} : memref<24x128xf32, #tpu.memory_space<vmem>>, vector<4x16xf32>,
    %c16 = arith.constant 16 : index
    %c0_8 = arith.constant 0 : index
    %8 = vector.load %arg9[%c16, %c0_8] : memref<24x128xf32, #tpu.memory_space<vmem>>, vector<4x16xf32>
    tpu.vector_store %arg9[%c16, %c0_8], %5 {strides = array<i32>} : memref<24x128xf32, #tpu.memory_space<vmem>>, vector<4x16xf32>,
    %c0_9 = arith.constant 0 : index
    %c0_10 = arith.constant 0 : index
    %9 = vector.load %arg2[%c0_9, %c0_10] : memref<8x24xf32, #tpu.memory_space<vmem>>, vector<8x24xf32>
    %c0_11 = arith.constant 0 : index
    %c0_12 = arith.constant 0 : index
    %10 = vector.load %arg9[%c0_11, %c0_12] : memref<24x128xf32, #tpu.memory_space<vmem>>, vector<24x128xf32>
    %cst_13 = arith.constant dense<0.000000e+00> : vector<8x128xf32>
    %11 = tpu.matmul %9, %10, %cst_13 {dimension_numbers = #tpu.dot_dimension_numbers<[1], [0], [0], [1], [0, 0, 1, 1], [], []>} : vector<8x24xf32>, vector<24x128xf32>, vector<8x128xf32> -> vector<8x128xf32>
    %c0_14 = arith.constant 0 : index
    %c0_15 = arith.constant 0 : index
    %12 = vector.load %arg3[%c0_14, %c0_15] : memref<8x1xf32, #tpu.memory_space<vmem>>, vector<8x1xf32>
    %13 = vector.broadcast %12 : vector<8x1xf32> to vector<8x128xf32>
    %14 = arith.addf %11, %13 : vector<8x128xf32>
    %cst_16 = arith.constant 0.000000e+00 : f32
    %15 = vector.broadcast %cst_16 : f32 to vector<8x128xf32>
    %16 = arith.maximumf %14, %15 : vector<8x128xf32>
    %17 = vector.extract_strided_slice %16 {offsets = [0, 0], sizes = [8, 16], strides = [1, 1]} : vector<8x128xf32> to vector<8x16xf32>
    %c0_17 = arith.constant 0 : index
    %c4_18 = arith.constant 4 : index
    %18 = vector.load %arg10[%c0_17, %c4_18] : memref<24x128xf32, #tpu.memory_space<vmem>>, vector<8x16xf32>
    tpu.vector_store %arg10[%c0_17, %c4_18], %17 {strides = array<i32>} : memref<24x128xf32, #tpu.memory_space<vmem>>, vector<8x16xf32>,
    %c8_19 = arith.constant 8 : index
    %c2_20 = arith.constant 2 : index
    %19 = vector.load %arg10[%c8_19, %c2_20] : memref<24x128xf32, #tpu.memory_space<vmem>>, vector<8x16xf32>
    tpu.vector_store %arg10[%c8_19, %c2_20], %17 {strides = array<i32>} : memref<24x128xf32, #tpu.memory_space<vmem>>, vector<8x16xf32>,
    %c16_21 = arith.constant 16 : index
    %c0_22 = arith.constant 0 : index
    %20 = vector.load %arg10[%c16_21, %c0_22] : memref<24x128xf32, #tpu.memory_space<vmem>>, vector<8x16xf32>
    tpu.vector_store %arg10[%c16_21, %c0_22], %17 {strides = array<i32>} : memref<24x128xf32, #tpu.memory_space<vmem>>, vector<8x16xf32>,
    %c0_23 = arith.constant 0 : index
    %c0_24 = arith.constant 0 : index
    %21 = vector.load %arg4[%c0_23, %c0_24] : memref<8x24xf32, #tpu.memory_space<vmem>>, vector<8x24xf32>
    %c0_25 = arith.constant 0 : index
    %c0_26 = arith.constant 0 : index
    %22 = vector.load %arg10[%c0_25, %c0_26] : memref<24x128xf32, #tpu.memory_space<vmem>>, vector<24x128xf32>
    %cst_27 = arith.constant dense<0.000000e+00> : vector<8x128xf32>
    %23 = tpu.matmul %21, %22, %cst_27 {dimension_numbers = #tpu.dot_dimension_numbers<[1], [0], [0], [1], [0, 0, 1, 1], [], []>} : vector<8x24xf32>, vector<24x128xf32>, vector<8x128xf32> -> vector<8x128xf32>
    %c0_28 = arith.constant 0 : index
    %c0_29 = arith.constant 0 : index
    %24 = vector.load %arg5[%c0_28, %c0_29] : memref<8x1xf32, #tpu.memory_space<vmem>>, vector<8x1xf32>
    %25 = vector.broadcast %24 : vector<8x1xf32> to vector<8x128xf32>
    %26 = arith.addf %23, %25 : vector<8x128xf32>
    %cst_30 = arith.constant 0.000000e+00 : f32
    %27 = vector.broadcast %cst_30 : f32 to vector<8x128xf32>
    %28 = arith.maximumf %26, %27 : vector<8x128xf32>
    %c16_31 = arith.constant 16 : index
    %c0_32 = arith.constant 0 : index
    %29 = vector.load %arg9[%c16_31, %c0_32] : memref<24x128xf32, #tpu.memory_space<vmem>>, vector<8x128xf32>
    %c0_33 = arith.constant 0 : index
    %c0_34 = arith.constant 0 : index
    %30 = vector.load %arg6[%c0_33, %c0_34] : memref<8x8xf32, #tpu.memory_space<vmem>>, vector<8x8xf32>
    %cst_35 = arith.constant dense<0.000000e+00> : vector<8x128xf32>
    %31 = tpu.matmul %30, %29, %cst_35 {dimension_numbers = #tpu.dot_dimension_numbers<[1], [0], [0], [1], [0, 0, 1, 1], [], []>} : vector<8x8xf32>, vector<8x128xf32>, vector<8x128xf32> -> vector<8x128xf32>
    %c0_36 = arith.constant 0 : index
    %c0_37 = arith.constant 0 : index
    %32 = vector.load %arg7[%c0_36, %c0_37] : memref<8x1xf32, #tpu.memory_space<vmem>>, vector<8x1xf32>
    %33 = vector.broadcast %32 : vector<8x1xf32> to vector<8x128xf32>
    %34 = arith.addf %31, %33 : vector<8x128xf32>
    %35 = arith.addf %28, %34 : vector<8x128xf32>
    %cst_38 = arith.constant 0.000000e+00 : f32
    %36 = vector.broadcast %cst_38 : f32 to vector<8x128xf32>
    %37 = arith.maximumf %35, %36 : vector<8x128xf32>
    %c0_39 = arith.constant 0 : index
    %c0_40 = arith.constant 0 : index
    %c0_41 = arith.constant 0 : index
    %38 = vector.load %arg8[%c0_39, %c0_40, %c0_41] : memref<1x8x128xf32, #tpu.memory_space<vmem>>, vector<1x8x128xf32>
    %39 = vector.shape_cast %38 : vector<1x8x128xf32> to vector<8x128xf32>
    %40 = vector.shape_cast %37 : vector<8x128xf32> to vector<1x8x128xf32>
    tpu.vector_store %arg8[%c0_39, %c0_40, %c0_41], %40 {strides = array<i32>} : memref<1x8x128xf32, #tpu.memory_space<vmem>>, vector<1x8x128xf32>,
    return
  }
  func.func @transform_0(%arg0: i32) -> (i32, i32, i32) {
    %c0_i32 = arith.constant 0 : i32
    %c0_i32_0 = arith.constant 0 : i32
    %c0_i32_1 = arith.constant 0 : i32
    return %arg0, %c0_i32, %c0_i32_0 : i32, i32, i32
  }
  func.func @transform_1(%arg0: i32) -> (i32, i32) {
    %c0_i32 = arith.constant 0 : i32
    %c0_i32_0 = arith.constant 0 : i32
    %c0_i32_1 = arith.constant 0 : i32
    return %c0_i32, %c0_i32_0 : i32, i32
  }
  func.func @transform_2(%arg0: i32) -> (i32, i32) {
    %c0_i32 = arith.constant 0 : i32
    %c0_i32_0 = arith.constant 0 : i32
    %c0_i32_1 = arith.constant 0 : i32
    return %c0_i32, %c0_i32_0 : i32, i32
  }
  func.func @transform_3(%arg0: i32) -> (i32, i32) {
    %c0_i32 = arith.constant 0 : i32
    %c0_i32_0 = arith.constant 0 : i32
    %c0_i32_1 = arith.constant 0 : i32
    return %c0_i32, %c0_i32_0 : i32, i32
  }
  func.func @transform_4(%arg0: i32) -> (i32, i32) {
    %c0_i32 = arith.constant 0 : i32
    %c0_i32_0 = arith.constant 0 : i32
    %c0_i32_1 = arith.constant 0 : i32
    return %c0_i32, %c0_i32_0 : i32, i32
  }
  func.func @transform_5(%arg0: i32) -> (i32, i32) {
    %c0_i32 = arith.constant 0 : i32
    %c0_i32_0 = arith.constant 0 : i32
    %c0_i32_1 = arith.constant 0 : i32
    return %c0_i32, %c0_i32_0 : i32, i32
  }
  func.func @transform_6(%arg0: i32) -> (i32, i32) {
    %c0_i32 = arith.constant 0 : i32
    %c0_i32_0 = arith.constant 0 : i32
    %c0_i32_1 = arith.constant 0 : i32
    return %c0_i32, %c0_i32_0 : i32, i32
  }
  func.func @transform_7(%arg0: i32) -> (i32, i32, i32) {
    %c0_i32 = arith.constant 0 : i32
    %c0_i32_0 = arith.constant 0 : i32
    %c0_i32_1 = arith.constant 0 : i32
    return %arg0, %c0_i32, %c0_i32_0 : i32, i32, i32
  }
}

</mosaic_0001>

<bundles_post_ra>
// kernel: tpu_custom_call.1
= control target key start
LH: loop header
LB: loop body
LE: loop exit
PB: predicated region body
PF: predicated region fallthrough
CT: control target
= control target key end

     0   :  { %12 = vsyncpa [#allocation5], 0  ;;  %s983_s0 = inlined_call_operand.vmem [shape: f32[2,4,16], index: 0, kind: input, shape index: {}]   ;;  %s984_s1 = inlined_call_operand.vmem [shape: f32[8,24], index: 1, kind: input, shape index: {}]   ;;  %s985_s2 = inlined_call_operand.vmem [shape: f32[8,1], index: 2, kind: input, shape index: {}]   ;;  %s986_s3 = inlined_call_operand.vmem [shape: f32[8,24], index: 3, kind: input, shape index: {}]   ;;  %s987_s4 = inlined_call_operand.vmem [shape: f32[8,1], index: 4, kind: input, shape index: {}]   ;;  %s988_s5 = inlined_call_operand.vmem [shape: f32[8,8], index: 5, kind: input, shape index: {}]   ;;  %s989_s6 = inlined_call_operand.vmem [shape: f32[8,1], index: 6, kind: input, shape index: {}]   ;;  %s990_s7 = inlined_call_operand.hbm [shape: f32[2,8,128], index: 7, kind: output, shape index: {}]  }
   0x1   :  { %14 = vsyncpa [#allocation5 + $0x1], 0  ;;  %s844_s24 = smov 0   ;;  %s846_s25 = smov 0  }
   0x2   :  { %s848_s26 = smov 0   ;;  %s850_s27 = smov 0  }
   0x3 LB: > { %s865_s28 = sadd.s32 4294967295, %s795_s27   ;;  %s634_s29 = sadd.s32 4294967294, %s795_s27   ;;  %s795_s27 = sphi %s850_s27, %s996_s27   ;;  %s791_s26 = sphi %s848_s26, %s995_s26   ;;  %s787_s25 = sphi %s846_s25, %s994_s25   ;;  %s783_s24 = sphi %s844_s24, %s993_s24  }
   0x4   : > { %s869_s30 = sadd.s32 1, %s795_s27   ;;  %s179_s8 = sadd.s32 1, %s791_s26 }
   0x5   : > { %s176_s9 = ssub.s32 %s795_s27, %s869_s30  ;;  %p189_p0 = scmp.ne.s32.totalorder %s791_s26, %s787_s25 }
   0x6   : > { %p177_p1 = scmp.eq.s32.totalorder %s176_s9, 0  ;;  %p190_p2 = scmp.eq.s32.totalorder %s865_s28, 1 }
   0x7   : > { %p195_p3 = scmp.ne.s32.totalorder %s787_s25, %s783_s24  ;;  %p196_p4 = scmp.eq.s32.totalorder %s634_s29, 1 }
   0x8   : > { %s880_s10 = scalar_select %p177_p1, %s791_s26, %s179_s8  }
   0x9   : > { %p882_p5 = por %p190_p2, %p189_p0  ;;  %p886_p6 = por %p196_p4, %p195_p3 }
   0xa   : > { %p637_p7 = scmp.ge.s32.totalorder %s795_s27, 1  ;;  %p239_p8 = scmp.lt.s32.totalorder %s795_s27, 3 }
   0xc   : > { %p240_p9 = pnand %p637_p7, %p239_p8 }
   0xd   : > { %p270_p10 = scmp.lt.s32.totalorder (!%p240_p9), %s865_s28, 1  ;;  %v797_v0 = vmov (!%p240_p9), 0.0   ;;  %v798_v1 = vmov (!%p240_p9), 0.0|0.0   ;;  %vm292_vm0 = vcmask (!%p240_p9), 125952   ;;  %s799_s18 = smov (!%p240_p9), 4   ;;  %vm801_vm1 = vmmov (!%p240_p9), 0  }
   0xe   : > { %243 = sbr.rel (%p240_p9) target bundleno = 741 (0x2e5), region = 48  ;;  %276 = vst [vmem:[#allocation2 + $0x10] sm:$0xff] (!%p240_p9), %v797_v0  ;;  %274 = vst [vmem:[#allocation2] sm:$0xff] (!%p240_p9), %v797_v0  ;;  %680 = vmatprep.subr.bf16.mxu0 (!%p240_p9), %v798_v1  ;;  %683 = vmatprep.subr.bf16.mxu1 (!%p240_p9), %v798_v1  ;;  %s800_s19 = smov (!%p240_p9), 2   ;;  %v298_v3 = vld [vmem:[%s985_s2] sm:$0xff] (!%p240_p9)  ;;  %v802_v4 = vmov (!%p240_p9), 0  }
   0xf   : > { %275 = vst [vmem:[#allocation2 + $0x8] sm:$0xff] (!%p240_p9), %v797_v0  ;;  %277 = vst [vmem:[#allocation3] sm:$0xff] (!%p240_p9), %v797_v0  ;;  %663 = vmatprep.mubr.msk.f32.mxu0 (!%p240_p9), %vm801_vm1, %v797_v0  ;;  %672 = vmatprep.mubr.msk.f32.mxu1 (!%p240_p9), %vm801_vm1, %v797_v0  ;;  %vm285_vm2 = vcmask (!%p240_p9), 158752   ;;  %vm290_vm3 = vcmask (!%p240_p9), 142352   ;;  %v294_v11 = vld [vmem:[%s984_s1] sm:$0xff] (!%p240_p9)  ;;  %vm304_vm4 = vcmask (!%p240_p9), 195584  }
  0x10   : > { %278 = vst [vmem:[#allocation3 + $0x8] sm:$0xff] (!%p240_p9), %v797_v0  ;;  %279 = vst [vmem:[#allocation3 + $0x10] sm:$0xff] (!%p240_p9), %v797_v0  ;;  %731 = vset.pattern.permute.xlu1 (!%p240_p9), %v802_v4  ;;  %732 = vset.pattern.permute.xlu0 (!%p240_p9), %v802_v4  ;;  %vm390_vm5 = vcmask (!%p240_p9), 130048   ;;  %v396_v17 = vld [vmem:[%s987_s4] sm:$0xff] (!%p240_p9)  ;;  %vm484_vm6 = vcmask (!%p240_p9), 64512   ;;  %vm388_vm7 = vcmask (!%p240_p9), 146448  }
  0x11   : > { %301 = vperm.xlu1 (!%p240_p9), %731, %v298_v3   ;;  %v477_v18 = vld [vmem:[%s988_s5] sm:$0xff] (!%p240_p9)  ;;  %vm383_vm8 = vcmask (!%p240_p9), 162848   ;;  %s644_s20 = sshll.u32 (!%p240_p9), %s865_s28, 7 }
  0x12   : > { %v478_v19 = vld [vmem:[%s989_s6] sm:$0xff] (!%p240_p9)  ;;  %s941_s8 = scalar_lea.hbm (!%p240_p9), %s990_s7, %s644_s20 }
  0x13   : > { %v392_v25 = vld [vmem:[%s986_s3] sm:$0xff] (!%p240_p9) }
  0x15   : > { %s271_s13 = scalar_select %p270_p10, %s865_s28, 1 }
  0x16   : > { %s803_s28 = smov [#allocation4]  }
  0x17   : > { %s639_s14 = sshll.u32 %s271_s13, 2 }
  0x18   : > { %s273_s17 = scalar_lea.vmem %s983_s0, %s639_s14  ;;  %s737_s14 = sshll.u32 %s803_s28, 4  ;;  %s738_s14 = int_to_ptr.vmem [resolvable:$false] %s737_s14 }
  0x19   : > { %v280_v2 = vld [vmem:[%s273_s17] sm:$0xf]  ;;  %s739_s15 = scalar_lea.vmem %s738_s14, 256 }
  0x1a   : > { %282 = vrot.lane.b32.xlu0 %v280_v2, %s799_s18  ;;  %293 = vst.msk [vmem:[#allocation2 + $0x10] sm:$0xf] %vm292_vm0, %v280_v2 }
  0x1e   : > { %287 = vrot.lane.b32.xlu0 %v280_v2, %s800_s19 }
  0x21   : > { %v297_v10 = vld [vmem:[#allocation2 + $0x10] sm:$0xff] }
  0x8c   : > { %v283_v5 = vpop.permute.xlu0 %282 }
  0x8d   : > { %286 = vst.msk [vmem:[#allocation2] sm:$0xf] %vm285_vm2, %v283_v5 }
  0x90   : > { %v288_v6 = vpop.permute.xlu0 %287  ;;  %v302_v12 = vpop.permute.xlu1 %301 }
  0x91   : > { %291 = vst.msk [vmem:[#allocation2 + $0x8] sm:$0xf] %vm290_vm3, %v288_v6 }
  0x94   : > { %v295_v7 = vld [vmem:[#allocation2] sm:$0xff] }
  0x98   : > { %v296_v8 = vld [vmem:[#allocation2 + $0x8] sm:$0xff] }
  0x99   : > { %v681_v9 = vpack.c.bf16 %v296_v8, %v295_v7 }
  0x9b   : > { %682 = vmatpush3.bf16.msra.mxu0 %v681_v9 }
  0x9c   : > { %661 = vmatprep.subr.mxu0 %v797_v0 }
  0x9f   : > { %662 = vmatpush3.msra.mxu0 %v297_v10 }
  0xa0   : > { %664 = vmatmul.mubr.msk.f32.vlgmr.msra.gmra.mrb[0].mxu0 %vm304_vm4, %v294_v11  ;;  %675 = vmatprep.subr.mxu0 %v797_v0 }
  0xa1   : > { %676 = vmatpush3.msra.mxu0 %v297_v10  ;;  %677 = vmatprep.mubr.msk.f32.mxu0 %vm801_vm1, %v797_v0 }
  0xa4   : > { %678 = vmatmul.mubr.msk.f32.vlgmr.msra.gmra.mrb[2].mxu0 %vm484_vm6, %v477_v18 }
 0x173   : > { %v374_v13 = vpop.f32.mrb[0].mxu0 }
 0x174   : > { %v375_v14 = vadd.f32 %v374_v13, %v302_v12  ;;  %v665_v15 = vpop.f32.mrb[1].mxu0 }
 0x176   : > { %v378_v16 = vmax.f32 %v375_v14, 0.0 }
 0x177   : > { %v554_v27 = vpop.f32.mrb[2].mxu0 }
 0x178   : > { %391 = vst.msk [vmem:[#allocation3 + $0x10] sm:$0xff] %vm390_vm5, %v378_v16  ;;  %385 = vrot.lane.b32.xlu0 %v378_v16, %s800_s19  ;;  %380 = vrot.lane.b32.xlu1 %v378_v16, %s799_s18  ;;  %v679_v28 = vpop.f32.mrb[3].mxu0  ;;  %s267_s18 = sand.u32 1, %s787_s25  }
 0x179   : > { %s638_s19 = sshll.u32 %s267_s18, 3  ;;  %s562_s9 = scalar_lea.sflag [#allocation5], %s267_s18 }
 0x17a   : > { %s269_s21 = scalar_lea.vmem [#allocation4], %s638_s19 }
 0x17b   : > { %s575_s22 = sshll.u32 %s269_s21, 4  ;;  %s943_s22 = int_to_ptr.vmem [resolvable:$true] %s575_s22 }
 0x17c   : > { %399 = vperm.xlu1 %731, %v396_v17   ;;  %481 = vperm.xlu0 %732, %v478_v19   ;;  %s733_s13 = scalar_lea.vmem %s943_s22, 128  ;;  %p740_p0 = scmp.lt.s32.totalorder %s943_s22, %s738_s14 }
 0x17d   : > { %p734_p11 = scmp.ne.s32.totalorder %s943_s22, %s733_s13  ;;  %p741_p1 = scmp.lt.s32.totalorder %s739_s15, %s733_s13 }
 0x17f   : > { %v395_v26 = vld [vmem:[#allocation3 + $0x10] sm:$0xff]  ;;  %p735_p12 = pnand %p734_p11, %p882_p5  ;;  %p742_p2 = por %p741_p1, %p740_p0 }
 0x181   : > { %p736_p13 = pneg %p735_p12 }
 0x183   : > { %p743_p3 = pnand %p742_p2, %p736_p13 }
 0x1ea   : > { %v386_v20 = vpop.permute.xlu0 %385  ;;  %v381_v21 = vpop.permute.xlu1 %380 }
 0x1eb   : > { %389 = vst.msk [vmem:[#allocation3 + $0x8] sm:$0xff] %vm388_vm7, %v386_v20 }
 0x1ec   : > { %384 = vst.msk [vmem:[#allocation3] sm:$0xff] %vm383_vm8, %v381_v21 }
 0x1f2   : > { %v394_v23 = vld [vmem:[#allocation3 + $0x8] sm:$0xff] }
 0x1f3   : > { %v393_v22 = vld [vmem:[#allocation3] sm:$0xff] }
 0x1f4   : > { %v684_v24 = vpack.c.bf16 %v394_v23, %v393_v22 }
 0x1f6   : > { %685 = vmatpush3.bf16.msra.mxu1 %v684_v24 }
 0x1f7   : > { %670 = vmatprep.subr.mxu1 %v797_v0 }
 0x1fa   : > { %671 = vmatpush3.msra.mxu1 %v395_v26 }
 0x1fb   : > { %673 = vmatmul.mubr.msk.f32.vlgmr.msra.gmra.mrb[0].mxu1 %vm304_vm4, %v392_v25  ;;  %v482_v29 = vpop.permute.xlu0 %481  ;;  %v400_v30 = vpop.permute.xlu1 %399 }
 0x1fc   : > { %v555_v34 = vadd.f32 %v554_v27, %v482_v29 }
 0x2ce   : > { %v471_v31 = vpop.f32.mrb[0].mxu1 }
 0x2cf   : > { %v472_v32 = vadd.f32 %v471_v31, %v400_v30  ;;  %v674_v33 = vpop.f32.mrb[1].mxu1 }
 0x2d1   : > { %v475_v35 = vmax.f32 %v472_v32, 0.0 }
 0x2d3   : > { %v558_v36 = vadd.f32 %v555_v34, %v475_v35 }
 0x2d5   : > { %v559_v37 = vmax.f32 %v558_v36, 0.0 }
 0x2d7   : > { %560 = vst [vmem:[%s269_s21] sm:$0xff] %v559_v37 }
 0x2d8   : > { %746 = shalt.err (!%p743_p3)
}
 0x2d9   : > { %s747_s16 = scalar_lea.hbm %s941_s8, 128  ;;  %s751_s19 = scalar_lea.hbm %s990_s7, 256 }
 0x2da   : > { %p748_p4 = scmp.ne.s32.totalorder %s941_s8, %s747_s16  ;;  %p752_p9 = scmp.lt.u32.totalorder %s941_s8, %s990_s7 }
 0x2db   : > { %p753_p10 = scmp.lt.u32.totalorder %s751_s19, %s747_s16  ;;  %p755_p12 = scmp.lt.u32.totalorder %s747_s16, %s941_s8 }
 0x2dc   : > { %p749_p7 = pnand %p748_p4, %p882_p5 }
 0x2dd   : > { %p754_p11 = por %p753_p10, %p752_p9 }
 0x2de   : > { %p750_p8 = pneg %p749_p7 }
 0x2df   : > { %p756_p13 = por %p755_p12, %p754_p11 }
 0x2e1   : > { %p757_p0 = pnand %p756_p13, %p750_p8 }
 0x2e3   : > { %760 = shalt.err (!%p757_p0)
}
 0x2e4   : > { %686 = dma.vmem_to_hbm [thread:$0]  (%p882_p5), %s943_s22, 128, %s941_s8, %s562_s9  }
 0x2e5 PF: > { %p692_p1 = scmp.ge.s32.totalorder %s795_s27, 2  ;;  %s587_s23 = sand.u32 1, %s783_s24  }
 0x2e6   : > { %s588_s29 = scalar_lea.sflag [#allocation5], %s587_s23 }
 0x2e7   : > { %p689_p2 = pnand %p692_p1, %p886_p6 }
 0x2e9   : > { %778 = dma.done.wait (!%p689_p2), %s588_s29, 128  }
 0x2ea   : > { %780 = vsyncadd (!%p689_p2), %s588_s29, 4294967168  ;;  %p17_p3 = scmp.ge.s32.totalorder %s869_s30, 4   ;;  %s993_s24 = smov %s787_s25 }
 0x2eb   : > { %s994_s25 = smov %s791_s26  ;;  %s995_s26 = smov %s880_s10 }
 0x2ec   : > { %s996_s27 = smov %s869_s30  ;;  %19 = sbr.rel (!%p17_p3) target bundleno = 3 (0x3), region = 83 }
 0x2f3   :  { %593 = vsyncpa [#allocation5], 1 }
 0x2f4   :  { %595 = vsyncpa [#allocation5 + $0x1], 1 }

</bundles_post_ra>
